<compile_context>
chip_gen: v5e
topology: v5e:2x2
jax: 0.10.0
libtpu: 0.0.40
codegen_flags: <defaults>
</compile_context>

<pallas_src>
import jax
import jax.numpy as jnp
from jax.experimental import pallas as pl
from jax.experimental.pallas import tpu as pltpu


NEG_INF_BIAS = -1e30  # bias value for padded vocab columns -> effectively -inf logits


def _round_up(x, m):
    return (x + m - 1) // m * m


def ngram_kernel(emb_ref, w1_ref, b1_ref, w2_ref, b2_ref, out_ref):
    # emb_ref: (TB, GEp) bf16, w1_ref: (GEp, Hp) bf16, b1_ref: (1, Hp) f32
    # w2_ref:  (Hp, Vp)  bf16, b2_ref: (1, Vp) f32 (padded cols = -1e30)
    x = emb_ref[...]

    # linear1 (bf16 MXU, f32 accumulate) + bias + ReLU in f32
    h = jnp.dot(x, w1_ref[...], preferred_element_type=jnp.float32)
    h = jnp.maximum(h + b1_ref[...], 0.0)                       # (TB, Hp) f32

    # linear2 (bf16 MXU, f32 accumulate) + bias
    logits = jnp.dot(h.astype(jnp.bfloat16), w2_ref[...],
                     preferred_element_type=jnp.float32) + b2_ref[...]

    # log_softmax over the (padded) vocab lanes; padded lanes hold ~-1e30 so
    # they contribute exp(-huge) == 0 to the denominator and never win the max.
    m = jnp.max(logits, axis=-1, keepdims=True)
    shifted = logits - m
    lse = jnp.log(jnp.sum(jnp.exp(shifted), axis=-1, keepdims=True))
    out_ref[...] = (shifted - lse).astype(out_ref.dtype)        # (TB, Vp)


def ngram_forward(ids, emb_table, w1, b1, w2, b2):
    """ids: (B, n_grams) int32; returns log-probs (B, vocab) f32."""
    B, n_grams = ids.shape
    V, E = emb_table.shape
    H = w1.shape[0]
    GE = n_grams * E

    # Glue: embedding lookup + flatten (== emb_table(inputs).view(B, -1)).
    embeds = jnp.take(emb_table, ids, axis=0).reshape(B, GE)

    # Lane/sublane-dense padded dims.
    GEp = _round_up(GE, 128)
    Hp = _round_up(H, 128)
    Vp = _round_up(V, 128)
    TB = 128 if B >= 128 else _round_up(B, 8)   # batch tile (sublane multiple)
    Bp = _round_up(B, TB)

    # Pad + cast operands. Zero padding is exact for GE/H (contributes 0 after
    # relu/zero-weight rows); padded V columns get a -1e30 bias (see kernel).
    emb_p = jnp.zeros((Bp, GEp), jnp.bfloat16).at[:B, :GE].set(
        embeds.astype(jnp.bfloat16))
    w1_p = jnp.zeros((GEp, Hp), jnp.bfloat16).at[:GE, :H].set(
        w1.T.astype(jnp.bfloat16))
    b1_p = jnp.zeros((1, Hp), jnp.float32).at[:, :H].set(
        b1.reshape(1, H).astype(jnp.float32))
    w2_p = jnp.zeros((Hp, Vp), jnp.bfloat16).at[:H, :V].set(
        w2.T.astype(jnp.bfloat16))
    b2_p = jnp.full((1, Vp), NEG_INF_BIAS, jnp.float32).at[:, :V].set(
        b2.reshape(1, V).astype(jnp.float32))

    grid = (Bp // TB,)

    out_p = pl.pallas_call(
        ngram_kernel,
        out_shape=jax.ShapeDtypeStruct((Bp, Vp), jnp.float32),
        grid=grid,
        in_specs=[
            pl.BlockSpec((TB, GEp), lambda i: (i, 0)),   # batch-tiled activations
            pl.BlockSpec((GEp, Hp), lambda i: (0, 0)),   # weights resident
            pl.BlockSpec((1, Hp), lambda i: (0, 0)),
            pl.BlockSpec((Hp, Vp), lambda i: (0, 0)),
            pl.BlockSpec((1, Vp), lambda i: (0, 0)),
        ],
        out_specs=pl.BlockSpec((TB, Vp), lambda i: (i, 0)),
        compiler_params=pltpu.CompilerParams(
            dimension_semantics=("parallel",),
            vmem_limit_bytes=64 << 20,
        ),
    )(emb_p, w1_p, b1_p, w2_p, b2_p)

    # Strip batch/vocab padding.
    return out_p[:B, :V]


def reference_forward_f32(ids, emb_table, w1, b1, w2, b2):
    """Pure-f32 JAX reference (matches the PyTorch module semantics)."""
    B = ids.shape[0]
    embeds = jnp.take(emb_table, ids, axis=0).reshape(B, -1)
    h = jnp.maximum(embeds @ w1.T + b1, 0.0)
    logits = h @ w2.T + b2
    return jax.nn.log_softmax(logits, axis=1)


def reference_forward_bf16(ids, emb_table, w1, b1, w2, b2):
    """Reference with the same bf16-input / f32-accumulate matmul casts."""
    B = ids.shape[0]
    embeds = jnp.take(emb_table, ids, axis=0).reshape(B, -1).astype(jnp.bfloat16)
    h = jnp.dot(embeds, w1.T.astype(jnp.bfloat16),
                preferred_element_type=jnp.float32) + b1
    h = jnp.maximum(h, 0.0)
    logits = jnp.dot(h.astype(jnp.bfloat16), w2.T.astype(jnp.bfloat16),
                     preferred_element_type=jnp.float32) + b2
    return jax.nn.log_softmax(logits, axis=1)


if __name__ == "__main__":
    # Small shapes consistent with the module.
    vocab_size = 32
    embedding_dim = 16
    batch_size = 8
    n_grams = 2
    hidden_size = 32

    key = jax.random.PRNGKey(0)
    k_emb, k_w1, k_b1, k_w2, k_b2, k_ids = jax.random.split(key, 6)

    # Deterministic synthetic parameters (same shapes as the nn.Module params).
    emb_table = jax.random.normal(k_emb, (vocab_size, embedding_dim), jnp.float32)
    w1 = jax.random.normal(k_w1, (hidden_size, n_grams * embedding_dim), jnp.float32) * 0.1
    b1 = jax.random.normal(k_b1, (hidden_size,), jnp.float32) * 0.1
    w2 = jax.random.normal(k_w2, (vocab_size, hidden_size), jnp.float32) * 0.1
    b2 = jax.random.normal(k_b2, (vocab_size,), jnp.float32) * 0.1

    ids = jax.random.randint(k_ids, (batch_size, n_grams), 0, vocab_size, jnp.int32)

    out = ngram_forward(ids, emb_table, w1, b1, w2, b2)
    out = jax.block_until_ready(out)

    assert out.shape == (batch_size, vocab_size)
    # Tight check against a reference with the same bf16 MXU casts.
    ref_bf16 = reference_forward_bf16(ids, emb_table, w1, b1, w2, b2)
    assert jnp.allclose(out, ref_bf16, atol=2e-3, rtol=2e-3), "mismatch vs bf16 reference"
    # Loose check against the pure-f32 module semantics.
    ref_f32 = reference_forward_f32(ids, emb_table, w1, b1, w2, b2)
    assert jnp.allclose(out, ref_f32, atol=5e-2, rtol=5e-2), "mismatch vs f32 reference"
    # Output must be a valid log-prob distribution per row.
    assert jnp.allclose(jnp.sum(jnp.exp(out), axis=1), 1.0, atol=1e-3)

    print("KERNEL_OK")
</pallas_src>

<mosaic_0001>
module attributes {stable_mosaic.version = 11 : i64} {
  func.func @ngram_kernel(%arg0: i32, %arg1: memref<8x128xbf16, #tpu.memory_space<vmem>>, %arg2: memref<128x128xbf16, #tpu.memory_space<vmem>>, %arg3: memref<1x128xf32, #tpu.memory_space<vmem>>, %arg4: memref<128x128xbf16, #tpu.memory_space<vmem>>, %arg5: memref<1x128xf32, #tpu.memory_space<vmem>>, %arg6: memref<8x128xf32, #tpu.memory_space<vmem>>) attributes {dimension_semantics = [#tpu.dimension_semantics<parallel>], iteration_bounds = array<i64: 1>, scalar_prefetch = 0 : i64, scratch_operands = 0 : i64, tpu.core_type = #tpu.core_type<tc>, window_params = [{transform_indices = @transform_0, window_bounds = array<i64: 8, 128>}, {pipeline_mode = #tpu.pipeline_mode<synchronous>, transform_indices = @transform_1, window_bounds = array<i64: 128, 128>}, {pipeline_mode = #tpu.pipeline_mode<synchronous>, transform_indices = @transform_2, window_bounds = array<i64: 1, 128>}, {pipeline_mode = #tpu.pipeline_mode<synchronous>, transform_indices = @transform_3, window_bounds = array<i64: 128, 128>}, {pipeline_mode = #tpu.pipeline_mode<synchronous>, transform_indices = @transform_4, window_bounds = array<i64: 1, 128>}, {transform_indices = @transform_5, window_bounds = array<i64: 8, 128>}]} {
    %c0 = arith.constant 0 : index
    %c0_0 = arith.constant 0 : index
    %0 = vector.load %arg1[%c0, %c0_0] : memref<8x128xbf16, #tpu.memory_space<vmem>>, vector<8x128xbf16>
    %c0_1 = arith.constant 0 : index
    %c0_2 = arith.constant 0 : index
    %1 = vector.load %arg2[%c0_1, %c0_2] : memref<128x128xbf16, #tpu.memory_space<vmem>>, vector<128x128xbf16>
    %cst = arith.constant dense<0.000000e+00> : vector<8x128xf32>
    %2 = tpu.matmul %0, %1, %cst {dimension_numbers = #tpu.dot_dimension_numbers<[1], [0], [0], [1], [0, 0, 1, 1], [], []>} : vector<8x128xbf16>, vector<128x128xbf16>, vector<8x128xf32> -> vector<8x128xf32>
    %c0_3 = arith.constant 0 : index
    %c0_4 = arith.constant 0 : index
    %3 = vector.load %arg3[%c0_3, %c0_4] : memref<1x128xf32, #tpu.memory_space<vmem>>, vector<1x128xf32>
    %4 = vector.broadcast %3 : vector<1x128xf32> to vector<8x128xf32>
    %5 = arith.addf %2, %4 : vector<8x128xf32>
    %cst_5 = arith.constant 0.000000e+00 : f32
    %6 = vector.broadcast %cst_5 : f32 to vector<8x128xf32>
    %7 = arith.maximumf %5, %6 : vector<8x128xf32>
    %8 = arith.truncf %7 : vector<8x128xf32> to vector<8x128xbf16>
    %c0_6 = arith.constant 0 : index
    %c0_7 = arith.constant 0 : index
    %9 = vector.load %arg4[%c0_6, %c0_7] : memref<128x128xbf16, #tpu.memory_space<vmem>>, vector<128x128xbf16>
    %cst_8 = arith.constant dense<0.000000e+00> : vector<8x128xf32>
    %10 = tpu.matmul %8, %9, %cst_8 {dimension_numbers = #tpu.dot_dimension_numbers<[1], [0], [0], [1], [0, 0, 1, 1], [], []>} : vector<8x128xbf16>, vector<128x128xbf16>, vector<8x128xf32> -> vector<8x128xf32>
    %c0_9 = arith.constant 0 : index
    %c0_10 = arith.constant 0 : index
    %11 = vector.load %arg5[%c0_9, %c0_10] : memref<1x128xf32, #tpu.memory_space<vmem>>, vector<1x128xf32>
    %12 = vector.broadcast %11 : vector<1x128xf32> to vector<8x128xf32>
    %13 = arith.addf %10, %12 : vector<8x128xf32>
    %cst_11 = arith.constant dense<0xFF800000> : vector<8xf32>
    %14 = vector.multi_reduction <maximumf>, %13, %cst_11 [1] : vector<8x128xf32> to vector<8xf32>
    %15 = vector.shape_cast %14 : vector<8xf32> to vector<8x1xf32>
    %16 = vector.broadcast %15 : vector<8x1xf32> to vector<8x128xf32>
    %17 = arith.subf %13, %16 : vector<8x128xf32>
    %18 = math.exp %17 : vector<8x128xf32>
    %cst_12 = arith.constant dense<0.000000e+00> : vector<8xf32>
    %19 = vector.multi_reduction <add>, %18, %cst_12 [1] : vector<8x128xf32> to vector<8xf32>
    %20 = vector.shape_cast %19 : vector<8xf32> to vector<8x1xf32>
    %21 = math.log %20 : vector<8x1xf32>
    %22 = vector.broadcast %21 : vector<8x1xf32> to vector<8x128xf32>
    %23 = arith.subf %17, %22 : vector<8x128xf32>
    %c0_13 = arith.constant 0 : index
    %c0_14 = arith.constant 0 : index
    %24 = vector.load %arg6[%c0_13, %c0_14] : memref<8x128xf32, #tpu.memory_space<vmem>>, vector<8x128xf32>
    tpu.vector_store %arg6[%c0_13, %c0_14], %23 {strides = array<i32>} : memref<8x128xf32, #tpu.memory_space<vmem>>, vector<8x128xf32>,
    return
  }
  func.func @transform_0(%arg0: i32) -> (i32, i32) {
    %c0_i32 = arith.constant 0 : i32
    %c0_i32_0 = arith.constant 0 : i32
    return %arg0, %c0_i32 : i32, i32
  }
  func.func @transform_1(%arg0: i32) -> (i32, i32) {
    %c0_i32 = arith.constant 0 : i32
    %c0_i32_0 = arith.constant 0 : i32
    %c0_i32_1 = arith.constant 0 : i32
    return %c0_i32, %c0_i32_0 : i32, i32
  }
  func.func @transform_2(%arg0: i32) -> (i32, i32) {
    %c0_i32 = arith.constant 0 : i32
    %c0_i32_0 = arith.constant 0 : i32
    %c0_i32_1 = arith.constant 0 : i32
    return %c0_i32, %c0_i32_0 : i32, i32
  }
  func.func @transform_3(%arg0: i32) -> (i32, i32) {
    %c0_i32 = arith.constant 0 : i32
    %c0_i32_0 = arith.constant 0 : i32
    %c0_i32_1 = arith.constant 0 : i32
    return %c0_i32, %c0_i32_0 : i32, i32
  }
  func.func @transform_4(%arg0: i32) -> (i32, i32) {
    %c0_i32 = arith.constant 0 : i32
    %c0_i32_0 = arith.constant 0 : i32
    %c0_i32_1 = arith.constant 0 : i32
    return %c0_i32, %c0_i32_0 : i32, i32
  }
  func.func @transform_5(%arg0: i32) -> (i32, i32) {
    %c0_i32 = arith.constant 0 : i32
    %c0_i32_0 = arith.constant 0 : i32
    return %arg0, %c0_i32 : i32, i32
  }
}

</mosaic_0001>

<bundles_post_ra>
// kernel: tpu_custom_call.1
= control target key start
LH: loop header
LB: loop body
LE: loop exit
PB: predicated region body
PF: predicated region fallthrough
CT: control target
= control target key end

     0   :  { %10 = vsyncpa [#allocation3], 0  ;;  %s508_s0 = inlined_call_operand.hbm [shape: bf16[8,128], index: 0, kind: input, shape index: {}]   ;;  %s509_s1 = inlined_call_operand.hbm [shape: bf16[128,128], index: 1, kind: input, shape index: {}]   ;;  %s510_s2 = inlined_call_operand.vmem [shape: f32[1,128], index: 2, kind: input, shape index: {}]   ;;  %s511_s3 = inlined_call_operand.hbm [shape: bf16[128,128], index: 3, kind: input, shape index: {}]   ;;  %s512_s4 = inlined_call_operand.vmem [shape: f32[1,128], index: 4, kind: input, shape index: {}]   ;;  %s513_s5 = inlined_call_operand.hbm [shape: f32[8,128], index: 5, kind: output, shape index: {}]  }
   0x1   :  { %11 = vsyncpa [#allocation6], 0  ;;  %s28_s20 = sshll.u32 %s509_s1, 4  ;;  %s29_s20 = int_to_ptr.hbm [resolvable:$true] %s28_s20 }
   0x2   :  { %12 = vsyncpa [#allocation4], 0  ;;  %s454_s21 = smov [#allocation5]   ;;  %s18_s25 = sshll.u32 %s508_s0, 4  ;;  %s19_s25 = int_to_ptr.hbm [resolvable:$true] %s18_s25 }
   0x3   :  { %s30_s22 = sshll.u32 %s454_s21, 4  ;;  %s455_s26 = smov 64   ;;  %s31_s22 = int_to_ptr.vmem [resolvable:$true] %s30_s22 }
   0x4   :  { %s456_s27 = smov 4   ;;  %s457_s28 = smov [#allocation2]  }
   0x5   :  { %36 = dma.hbm_to_vmem [thread:$0]  %s29_s20, 1024, %s31_s22, [#allocation6], %s455_s26, %s455_s26, %s456_s27  }
   0x6   :  { %s20_s29 = sshll.u32 %s457_s28, 4  ;;  %s43_s7 = sshll.u32 %s511_s3, 4  ;;  %s21_s29 = int_to_ptr.vmem [resolvable:$true] %s20_s29  ;;  %s44_s7 = int_to_ptr.hbm [resolvable:$true] %s43_s7 }
   0x7   :  { %23 = dma.hbm_to_vmem [thread:$0]  %s19_s25, 64, %s21_s29, [#allocation3]  }
   0x8   :  { %s458_s1 = smov [#allocation7]  }
   0x9   :  { %s45_s8 = sshll.u32 %s458_s1, 4  ;;  %s46_s8 = int_to_ptr.vmem [resolvable:$true] %s45_s8 }
   0xa   :  { %51 = dma.hbm_to_vmem [thread:$0]  %s44_s7, 1024, %s46_s8, [#allocation6], %s455_s26, %s455_s26, %s456_s27  }
   0xb   :  { %448 = dma.done.wait [#allocation3], 64  }
   0xc   :  { %449 = vsyncadd [#allocation3], 4294967232 }
   0xd   :  { %450 = dma.done.wait [#allocation6], 2048  }
   0xe   :  { %451 = vsyncadd [#allocation6], 4294965248  ;;  %v331_v0 = vld [vmem:[#allocation5 + $0x38] sm:$0xff]  ;;  %v330_v1 = vld [vmem:[#allocation5 + $0x30] sm:$0xff]  ;;  %s249_s14 = sshll.u32 %s513_s5, 4  ;;  %s250_s14 = int_to_ptr.hbm [resolvable:$true] %s249_s14 }
   0xf   :  { %135 = vmatpush.bf16.msra.mxu0 %v331_v0  ;;  %v339_v2 = vld [vmem:[#allocation7 + $0x38] sm:$0xff]  ;;  %v338_v3 = vld [vmem:[#allocation7 + $0x30] sm:$0xff]  ;;  %v329_v4 = vld [vmem:[#allocation5 + $0x28] sm:$0xff] }
  0x10   :  { %218 = vmatpush.bf16.msra.mxu1 %v339_v2  ;;  %v337_v5 = vld [vmem:[#allocation7 + $0x28] sm:$0xff]  ;;  %v328_v6 = vld [vmem:[#allocation5 + $0x20] sm:$0xff]  ;;  %v327_v8 = vld [vmem:[#allocation5 + $0x18] sm:$0xff] }
  0x11   :  { %v336_v7 = vld [vmem:[#allocation7 + $0x20] sm:$0xff]  ;;  %v335_v9 = vld [vmem:[#allocation7 + $0x18] sm:$0xff]  ;;  %v326_v10 = vld [vmem:[#allocation5 + $0x10] sm:$0xff] }
  0x12   :  { %v334_v11 = vld [vmem:[#allocation7 + $0x10] sm:$0xff]  ;;  %v325_v12 = vld [vmem:[#allocation5 + $0x8] sm:$0xff]  ;;  %v324_v13 = vld [vmem:[#allocation5] sm:$0xff] }
  0x13   :  { %136 = vmatpush.bf16.msra.mxu0 %v330_v1  ;;  %v66_v14 = vld [vmem:[#allocation2] sm:$0xf]  ;;  %v333_v15 = vld [vmem:[#allocation7 + $0x8] sm:$0xff]  ;;  %v332_v16 = vld [vmem:[#allocation7] sm:$0xff] }
  0x14   :  { %219 = vmatpush.bf16.msra.mxu1 %v338_v3  ;;  %v346_v17 = vld [vmem:[%s510_s2] ss:$0 sm:$0xff]  ;;  %s459_s2 = smov [#allocation8]  }
  0x15   :  { %v347_v23 = vld [vmem:[%s512_s4] ss:$0 sm:$0xff]  ;;  %s247_s11 = sshll.u32 %s459_s2, 4  ;;  %s248_s11 = int_to_ptr.vmem [resolvable:$true] %s247_s11 }
  0x17   :  { %137 = vmatpush.bf16.msra.mxu0 %v329_v4 }
  0x18   :  { %220 = vmatpush.bf16.msra.mxu1 %v337_v5 }
  0x1b   :  { %138 = vmatpush.bf16.msra.mxu0 %v328_v6 }
  0x1c   :  { %221 = vmatpush.bf16.msra.mxu1 %v336_v7 }
  0x1f   :  { %139 = vmatpush.bf16.msra.mxu0 %v327_v8 }
  0x20   :  { %222 = vmatpush.bf16.msra.mxu1 %v335_v9 }
  0x23   :  { %140 = vmatpush.bf16.msra.mxu0 %v326_v10 }
  0x24   :  { %223 = vmatpush.bf16.msra.mxu1 %v334_v11 }
  0x27   :  { %141 = vmatpush.bf16.msra.mxu0 %v325_v12 }
  0x28   :  { %224 = vmatpush.bf16.msra.mxu1 %v333_v15 }
  0x2b   :  { %142 = vmatpush.bf16.msra.mxu0 %v324_v13 }
  0x2c   :  { %225 = vmatpush.bf16.msra.mxu1 %v332_v16 }
  0x2e   :  { %143 = vmatmul.bf16.vlgmr.msra.gmra.mxu0 %v66_v14 }
  0xab   :  { %v144_v18 = vpop.f32.mrf.mxu0 }
  0xac   :  { %v145_v19 = vadd.f32 %v346_v17, %v144_v18 }
  0xae   :  { %v148_v20 = vmax.f32 %v145_v19, 0.0 }
  0xb0   :  { %v149_v21 = vpack.c.bf16 %v148_v20, %v148_v20 }
  0xb2   :  { %226 = vmatmul.bf16.vlgmr.msra.gmra.mxu1 %v149_v21 }
  0xb3   :  { %v146_v22 = vpop.f32.mrf.mxu0 }
 0x12f   :  { %v227_v24 = vpop.f32.mrf.mxu1 }
 0x130   :  { %v228_v25 = vadd.f32 %v347_v23, %v227_v24 }
 0x132   :  { %231 = vmax.xlane.f32.xlu0 %v228_v25 }
 0x137   :  { %v229_v26 = vpop.f32.mrf.mxu1 }
 0x1a5   :  { %v232_v27 = vpop.xlane.xlu0 %231 }
 0x1a6   :  { %v233_v28 = vsub.f32 %v228_v25, %v232_v27 }
 0x1a8   :  { %v234_v29 = vmul.f32 1.442695, %v233_v28 }
 0x1aa   :  { %348 = vpow2.f32 %v234_v29 }
 0x1b0   :  { %v349_v30 = vpop.eup %348 }
 0x1b1   :  { %236 = vadd.xlane.f32.xlu0 %v349_v30 }
 0x224   :  { %v237_v31 = vpop.xlane.xlu0 %236 }
 0x225   :  { %350 = vlog2.f32 %v237_v31 }
 0x22b   :  { %v351_v32 = vpop.eup %350 }
 0x22c   :  { %v239_v33 = vmul.f32 0.6931472, %v351_v32 }
 0x22e   :  { %v240_v34 = vsub.f32 %v233_v28, %v239_v33 }
 0x230   :  { %241 = vst [vmem:[#allocation8] sm:$0xff] %v240_v34 }
 0x231   :  { %252 = dma.vmem_to_hbm [thread:$0]  %s248_s11, 128, %s250_s14, [#allocation4]  }
 0x232   :  { %452 = dma.done.wait [#allocation4], 128  }
 0x233   :  { %453 = vsyncadd [#allocation4], 4294967168 }
 0x234   :  { %257 = vsyncpa [#allocation3], 1 }
 0x235   :  { %258 = vsyncpa [#allocation6], 1 }
 0x236   :  { %259 = vsyncpa [#allocation4], 1 }

</bundles_post_ra>
